<compile_context>
chip_gen: v6e
topology: v6e:2x2x1
jax: 0.10.0
libtpu: 0.0.40
codegen_flags: <defaults>
</compile_context>

<pallas_src>
import math

import jax
import jax.numpy as jnp
from jax import lax
from jax.experimental import pallas as pl
from jax.experimental.pallas import tpu as pltpu


# ----------------------------------------------------------------------------
# Faithful port of the abstract PyTorch module (no params, abstract forward).
# ----------------------------------------------------------------------------
class AbstractLoss:
    def __init__(self):
        # nn.Module.__init__ equivalent: no parameters, no buffers.
        pass

    def forward(self, *args, **kwargs):
        msg = 'forward should be implemented by subclass.'
        raise NotImplementedError(msg)

    def __call__(self, *args, **kwargs):
        # Delegate through self.forward so subclass overrides take effect.
        return self.forward(*args, **kwargs)


# ----------------------------------------------------------------------------
# Tiling helpers (dtype-, VMEM- and generation-aware).
# ----------------------------------------------------------------------------
_MAX_TILE_ROWS = 8192  # big tiles amortize ~0.35us/step overhead (v7x HBM is fast)


def _sublane_multiple(dtype) -> int:
    """Native sublane packing: 8 rows for 32-bit, 16 for bf16, 32 for 8-bit."""
    itemsize = jnp.dtype(dtype).itemsize
    return max(8, 32 // max(itemsize, 1))


def _vmem_budget_and_limit():
    """Per-generation tile-scratch budget and explicit scoped-VMEM limit."""
    try:
        cap = int(pltpu.get_tpu_info().vmem_capacity_bytes)
    except Exception:
        cap = 64 * 1024 * 1024  # conservative (v7x per-core physical VMEM)
    budget = max(cap // 4, 4 * 1024 * 1024)          # live pipelined tiles
    limit = min(cap, budget + 16 * 1024 * 1024)      # headroom for Mosaic internals
    return budget, limit


def _pick_tile(num_rows, num_cols, sub, live_bytes_per_elem, budget):
    """Pick (tile_rows, tile_cols) that fit the double-buffered VMEM budget.

    live_bytes_per_elem already accounts for every live copy of an element
    (both inputs x double buffering).  If even a modest-height full-width tile
    overflows the budget, the feature axis is split in lane-dense multiples of
    128 instead of shrinking rows to useless heights (review fallback).
    """
    rows_up = -(-num_rows // sub) * sub

    tile_cols = num_cols
    min_rows = min(rows_up, max(sub, 64))
    if num_cols > 128 and min_rows * num_cols * live_bytes_per_elem > budget:
        cols_fit = budget // max(min_rows * live_bytes_per_elem, 1)
        tile_cols = max(128, (cols_fit // 128) * 128)

    rows_fit = budget // max(tile_cols * live_bytes_per_elem, 1)
    tile_rows = max(sub, (min(rows_fit, _MAX_TILE_ROWS, rows_up) // sub) * sub)
    return tile_rows, tile_cols


# ----------------------------------------------------------------------------
# Fused residual + reduction kernel (the pattern concrete subclasses use).
# One pallas_call: read pred/target tiles once, square the residual, reduce
# the tile to an (8, PW) lane-dense f32 partial block owned by that grid
# point.  Both grid axes are "parallel" (no shared accumulator -> no races,
# dual-TC shardable on v7x).  The tiny partial slab is summed in the wrapper.
# ----------------------------------------------------------------------------
def fused_squared_error_loss(pred: jax.Array, target: jax.Array, *,
                             reduction: str = "mean") -> jax.Array:
    if pred.shape != target.shape:
        raise ValueError(f"shape mismatch: {pred.shape} vs {target.shape}")

    if pred.ndim == 0:
        rows, feat = 1, 1
        p2, t2 = pred.reshape(1, 1), target.reshape(1, 1)
    else:
        feat = pred.shape[-1]
        n = math.prod(pred.shape)
        rows = max(n // max(feat, 1), 1)
        p2, t2 = pred.reshape(rows, feat), target.reshape(rows, feat)
    n_elems = rows * feat

    budget, vmem_limit = _vmem_budget_and_limit()
    sub = max(_sublane_multiple(p2.dtype), _sublane_multiple(t2.dtype))
    # Live VMEM per element: 2 inputs x 2 pipeline buffers (outputs are tiny).
    live_bpe = 2 * (jnp.dtype(p2.dtype).itemsize + jnp.dtype(t2.dtype).itemsize)
    tile_rows, tile_cols = _pick_tile(rows, feat, sub, live_bpe, budget)

    gr = pl.cdiv(rows, tile_rows)
    gc = pl.cdiv(feat, tile_cols)
    # Lane width of the per-tile partial: fold down to 128 lanes when possible,
    # otherwise keep the (narrow) full feature width. Either way the output
    # block's last dims satisfy the (8, 128)-or-full-dim rule.
    pw = 128 if (tile_cols % 128 == 0) else tile_cols
    mask_rows = (rows % tile_rows) != 0
    mask_cols = (feat % tile_cols) != 0

    def kernel(p_ref, t_ref, o_ref):
        d = p_ref[...].astype(jnp.float32) - t_ref[...].astype(jnp.float32)
        sq = d * d
        if mask_rows or mask_cols:  # trace-time switch: only pay when ragged
            m = None
            if mask_rows:
                rid = pl.program_id(0) * tile_rows + lax.broadcasted_iota(
                    jnp.int32, (tile_rows, tile_cols), 0)
                m = rid < rows
            if mask_cols:
                cid = pl.program_id(1) * tile_cols + lax.broadcasted_iota(
                    jnp.int32, (tile_rows, tile_cols), 1)
                cm = cid < feat
                m = cm if m is None else (m & cm)
            sq = jnp.where(m, sq, 0.0)
        # Fold sublane groups: (TR, TC) -> (TR//8, 8, TC) -> (8, TC).
        s8 = sq.reshape(tile_rows // 8, 8, tile_cols).sum(axis=0)
        # Fold lane groups with static 128-wide slices (VPU adds, lane-dense).
        s = s8[:, 0:pw]
        for j in range(1, tile_cols // pw):
            s = s + s8[:, j * pw:(j + 1) * pw]
        o_ref[0, 0] = s

    itemsize_total = (jnp.dtype(p2.dtype).itemsize +
                      jnp.dtype(t2.dtype).itemsize)
    cost = pl.CostEstimate(
        flops=3 * n_elems,
        transcendentals=0,
        bytes_accessed=n_elems * itemsize_total + gr * gc * 8 * pw * 4,
    )

    partials = pl.pallas_call(
        kernel,
        out_shape=jax.ShapeDtypeStruct((gr, gc, 8, pw), jnp.float32),
        grid_spec=pltpu.PrefetchScalarGridSpec(
            num_scalar_prefetch=0,
            grid=(gr, gc),
            in_specs=[
                pl.BlockSpec((tile_rows, tile_cols), lambda i, j: (i, j)),
                pl.BlockSpec((tile_rows, tile_cols), lambda i, j: (i, j)),
            ],
            # Each grid point owns its own lane-dense partial block.
            out_specs=pl.BlockSpec((1, 1, 8, pw), lambda i, j: (i, j, 0, 0)),
        ),
        compiler_params=pltpu.CompilerParams(
            # No shared accumulator -> both axes safely "parallel"
            # (dual-TC sharding on v7x; no-op on v5e/v6e).
            dimension_semantics=("parallel", "parallel"),
            vmem_limit_bytes=vmem_limit,
        ),
        cost_estimate=cost,
    )(p2, t2)

    total = jnp.sum(partials)
    if reduction == "mean":
        return total / jnp.float32(n_elems)
    if reduction == "sum":
        return total
    raise ValueError(f"unsupported reduction: {reduction!r}")


# ----------------------------------------------------------------------------
# Example concrete subclass showing how forward() should be implemented
# (fused residual + reduction, single pallas_call).
# ----------------------------------------------------------------------------
class MSELoss(AbstractLoss):
    def __init__(self, reduction: str = "mean"):
        super().__init__()
        self.reduction = reduction

    def forward(self, pred, target):
        return fused_squared_error_loss(pred, target, reduction=self.reduction)


if __name__ == "__main__":
    # 1) Exact semantics of the abstract module: forward must raise.
    base = AbstractLoss()
    for fn in (base.forward, base):
        try:
            fn()
            raise AssertionError("AbstractLoss.forward should have raised")
        except NotImplementedError as e:
            assert str(e) == 'forward should be implemented by subclass.'

    key = jax.random.PRNGKey(0)
    k1, k2, k3, k4, k5, k6 = jax.random.split(key, 6)
    loss = MSELoss()

    # 2) f32, (2, 4, 16, 16): narrow feature axis (16 lanes), divisible rows.
    p = jax.random.normal(k1, (2, 4, 16, 16), dtype=jnp.float32)
    t = jax.random.normal(k2, (2, 4, 16, 16), dtype=jnp.float32)
    out = jax.block_until_ready(loss(p, t))
    ref = jnp.mean((p - t) ** 2)
    assert out.shape == () and out.dtype == jnp.float32
    assert bool(jnp.allclose(out, ref, rtol=1e-4, atol=1e-6)), (out, ref)

    # 3) bf16, (8, 48, 384): 16-row sublane packing, feature axis folded in
    #    three lane-dense 128-wide groups.
    p = jax.random.normal(k3, (8, 48, 384), dtype=jnp.bfloat16)
    t = jax.random.normal(k4, (8, 48, 384), dtype=jnp.bfloat16)
    out = jax.block_until_ready(loss(p, t))
    ref = jnp.mean((p.astype(jnp.float32) - t.astype(jnp.float32)) ** 2)
    assert bool(jnp.allclose(out, ref, rtol=1e-4, atol=1e-5)), (out, ref)

    # 4) f32, (5, 7, 48): ragged row count exercises the in-kernel mask path.
    p = jax.random.normal(k5, (5, 7, 48), dtype=jnp.float32)
    t = jax.random.normal(k6, (5, 7, 48), dtype=jnp.float32)
    out = jax.block_until_ready(loss(p, t))
    ref = jnp.mean((p - t) ** 2)
    assert bool(jnp.allclose(out, ref, rtol=1e-4, atol=1e-6)), (out, ref)

    print("KERNEL_OK")
</pallas_src>

<mosaic_0001>
module attributes {stable_mosaic.version = 11 : i64} {
  func.func @kernel(%arg0: i32, %arg1: i32, %arg2: memref<128x16xf32, #tpu.memory_space<vmem>>, %arg3: memref<128x16xf32, #tpu.memory_space<vmem>>, %arg4: memref<1x1x8x16xf32, #tpu.memory_space<vmem>>) attributes {dimension_semantics = [#tpu.dimension_semantics<parallel>, #tpu.dimension_semantics<parallel>], iteration_bounds = array<i64: 1, 1>, scalar_prefetch = 0 : i64, scratch_operands = 0 : i64, tpu.core_type = #tpu.core_type<tc>, window_params = [{transform_indices = @transform_0, window_bounds = array<i64: 128, 16>}, {transform_indices = @transform_1, window_bounds = array<i64: 128, 16>}, {transform_indices = @transform_2, window_bounds = array<i64: 1, 1, 8, 16>}]} {
    %c0 = arith.constant 0 : index
    %c0_0 = arith.constant 0 : index
    %0 = vector.load %arg2[%c0, %c0_0] : memref<128x16xf32, #tpu.memory_space<vmem>>, vector<128x16xf32>
    %c0_1 = arith.constant 0 : index
    %c0_2 = arith.constant 0 : index
    %1 = vector.load %arg3[%c0_1, %c0_2] : memref<128x16xf32, #tpu.memory_space<vmem>>, vector<128x16xf32>
    %2 = arith.subf %0, %1 : vector<128x16xf32>
    %3 = arith.mulf %2, %2 : vector<128x16xf32>
    %4 = vector.shape_cast %3 : vector<128x16xf32> to vector<16x8x16xf32>
    %cst = arith.constant dense<0.000000e+00> : vector<8x16xf32>
    %5 = vector.multi_reduction <add>, %4, %cst [0] : vector<16x8x16xf32> to vector<8x16xf32>
    %c0_3 = arith.constant 0 : index
    %c0_4 = arith.constant 0 : index
    %c0_5 = arith.constant 0 : index
    %c0_6 = arith.constant 0 : index
    %6 = vector.load %arg4[%c0_3, %c0_4, %c0_5, %c0_6] : memref<1x1x8x16xf32, #tpu.memory_space<vmem>>, vector<1x1x8x16xf32>
    %7 = vector.shape_cast %6 : vector<1x1x8x16xf32> to vector<8x16xf32>
    %8 = vector.shape_cast %5 : vector<8x16xf32> to vector<1x1x8x16xf32>
    tpu.vector_store %arg4[%c0_3, %c0_4, %c0_5, %c0_6], %8 {strides = array<i32>} : memref<1x1x8x16xf32, #tpu.memory_space<vmem>>, vector<1x1x8x16xf32>,
    return
  }
  func.func @transform_0(%arg0: i32, %arg1: i32) -> (i32, i32) {
    %c0_i32 = arith.constant 0 : i32
    return %arg0, %arg1 : i32, i32
  }
  func.func @transform_1(%arg0: i32, %arg1: i32) -> (i32, i32) {
    %c0_i32 = arith.constant 0 : i32
    return %arg0, %arg1 : i32, i32
  }
  func.func @transform_2(%arg0: i32, %arg1: i32) -> (i32, i32, i32, i32) {
    %c0_i32 = arith.constant 0 : i32
    %c0_i32_0 = arith.constant 0 : i32
    %c0_i32_1 = arith.constant 0 : i32
    return %arg0, %arg1, %c0_i32, %c0_i32_0 : i32, i32, i32, i32
  }
}

</mosaic_0001>

<bundles_post_ra>
// kernel: tpu_custom_call.1
= control target key start
LH: loop header
LB: loop body
LE: loop exit
PB: predicated region body
PF: predicated region fallthrough
CT: control target
= control target key end

     0   :  { %s278_s0 = inlined_call_operand.vmem [shape: f32[128,16], index: 0, kind: input, shape index: {}]   ;;  %s279_s1 = inlined_call_operand.vmem [shape: f32[128,16], index: 1, kind: input, shape index: {}]   ;;  %s280_s2 = inlined_call_operand.hbm [shape: f32[1,1,8,16], index: 2, kind: output, shape index: {}]  }
   0x1   :  { %v12_v0 = vld [vmem:[%s278_s0] sm:$0xff]  ;;  %v13_v1 = vld [vmem:[%s278_s0 + $0x8] sm:$0xff]  ;;  %v14_v2 = vld [vmem:[%s278_s0 + $0x10] sm:$0xff] }
   0x2   :  { %v28_v3 = vld [vmem:[%s279_s1] sm:$0xff]  ;;  %v29_v4 = vld [vmem:[%s279_s1 + $0x8] sm:$0xff]  ;;  %v15_v5 = vld [vmem:[%s278_s0 + $0x18] sm:$0xff] }
   0x3   :  { %v30_v6 = vld [vmem:[%s279_s1 + $0x10] sm:$0xff]  ;;  %v31_v7 = vld [vmem:[%s279_s1 + $0x18] sm:$0xff]  ;;  %v44_v8 = vsub.f32 %v12_v0, %v28_v3  ;;  %v45_v9 = vsub.f32 %v13_v1, %v29_v4  ;;  %v16_v11 = vld [vmem:[%s278_s0 + $0x20] sm:$0xff] }
   0x4   :  { %v46_v10 = vsub.f32 %v14_v2, %v30_v6  ;;  %v32_v12 = vld [vmem:[%s279_s1 + $0x20] sm:$0xff]  ;;  %v47_v13 = vsub.f32 %v15_v5, %v31_v7  ;;  %v17_v14 = vld [vmem:[%s278_s0 + $0x28] sm:$0xff] }
   0x5   :  { %v33_v15 = vld [vmem:[%s279_s1 + $0x28] sm:$0xff]  ;;  %v60_v16 = vmul.f32 %v44_v8, %v44_v8 }
   0x6   :  { %7 = vsyncpa [#allocation3], 0  ;;  %v48_v17 = vsub.f32 %v16_v11, %v32_v12  ;;  %v61_v18 = vmul.f32 %v45_v9, %v45_v9  ;;  %v62_v19 = vmul.f32 %v46_v10, %v46_v10  ;;  %vm76_vm0 = vcmask 130048   ;;  %v18_v20 = vld [vmem:[%s278_s0 + $0x30] sm:$0xff]  ;;  %v19_v24 = vld [vmem:[%s278_s0 + $0x38] sm:$0xff] }
   0x7   :  { %v34_v21 = vld [vmem:[%s279_s1 + $0x30] sm:$0xff]  ;;  %v49_v22 = vsub.f32 %v17_v14, %v33_v15  ;;  %v63_v23 = vmul.f32 %v47_v13, %v47_v13  ;;  %v35_v25 = vld [vmem:[%s279_s1 + $0x38] sm:$0xff]  ;;  %v77_v26 = vsel %vm76_vm0, %v60_v16, 0.0  ;;  %v20_v31 = vld [vmem:[%s278_s0 + $0x40] sm:$0xff] }
   0x8   :  { %v50_v27 = vsub.f32 %v18_v20, %v34_v21  ;;  %v64_v28 = vmul.f32 %v48_v17, %v48_v17  ;;  %v78_v29 = vsel %vm76_vm0, %v61_v18, 0.0  ;;  %v80_v30 = vsel %vm76_vm0, %v62_v19, 0.0  ;;  %v36_v32 = vld [vmem:[%s279_s1 + $0x40] sm:$0xff]  ;;  %v21_v37 = vld [vmem:[%s278_s0 + $0x48] sm:$0xff]  ;;  %v22_v43 = vld [vmem:[%s278_s0 + $0x50] sm:$0xff] }
   0x9   :  { %v79_v33 = vadd.f32 %v78_v29, %v77_v26  ;;  %v51_v34 = vsub.f32 %v19_v24, %v35_v25  ;;  %v65_v35 = vmul.f32 %v49_v22, %v49_v22  ;;  %v82_v36 = vsel %vm76_vm0, %v63_v23, 0.0  ;;  %v37_v38 = vld [vmem:[%s279_s1 + $0x48] sm:$0xff]  ;;  %v38_v44 = vld [vmem:[%s279_s1 + $0x50] sm:$0xff]  ;;  %v23_v49 = vld [vmem:[%s278_s0 + $0x58] sm:$0xff] }
   0xa   :  { %v52_v40 = vsub.f32 %v20_v31, %v36_v32  ;;  %v66_v41 = vmul.f32 %v50_v27, %v50_v27  ;;  %v84_v42 = vsel %vm76_vm0, %v64_v28, 0.0  ;;  %v53_v46 = vsub.f32 %v21_v37, %v37_v38  ;;  %v39_v50 = vld [vmem:[%s279_s1 + $0x58] sm:$0xff]  ;;  %v24_v55 = vld [vmem:[%s278_s0 + $0x60] sm:$0xff]  ;;  %v25_v61 = vld [vmem:[%s278_s0 + $0x68] sm:$0xff] }
   0xb   :  { %v81_v39 = vadd.f32 %v80_v30, %v79_v33  ;;  %v67_v47 = vmul.f32 %v51_v34, %v51_v34  ;;  %v86_v48 = vsel %vm76_vm0, %v65_v35, 0.0  ;;  %v54_v52 = vsub.f32 %v22_v43, %v38_v44  ;;  %v40_v56 = vld [vmem:[%s279_s1 + $0x60] sm:$0xff]  ;;  %v41_v62 = vld [vmem:[%s279_s1 + $0x68] sm:$0xff]  ;;  %v26_v3 = vld [vmem:[%s278_s0 + $0x70] sm:$0xff] }
   0xc   :  { %v68_v53 = vmul.f32 %v52_v40, %v52_v40  ;;  %v88_v54 = vsel %vm76_vm0, %v66_v41, 0.0  ;;  %v55_v58 = vsub.f32 %v23_v49, %v39_v50  ;;  %v69_v59 = vmul.f32 %v53_v46, %v53_v46  ;;  %v42_v4 = vld [vmem:[%s279_s1 + $0x70] sm:$0xff]  ;;  %v27_v9 = vld [vmem:[%s278_s0 + $0x78] sm:$0xff]  ;;  %s146_s0 = smov [#allocation2]  }
   0xd   :  { %v83_v45 = vadd.f32 %v82_v36, %v81_v39  ;;  %v90_v60 = vsel %vm76_vm0, %v67_v47, 0.0  ;;  %v56_v0 = vsub.f32 %v24_v55, %v40_v56  ;;  %v70_v1 = vmul.f32 %v54_v52, %v54_v52  ;;  %v43_v10 = vld [vmem:[%s279_s1 + $0x78] sm:$0xff]  ;;  %s115_s1 = sshll.u32 %s146_s0, 4  ;;  %s116_s1 = int_to_ptr.vmem [resolvable:$true] %s115_s1 }
   0xe   :  { %v92_v2 = vsel %vm76_vm0, %v68_v53, 0.0  ;;  %v57_v6 = vsub.f32 %v25_v61, %v41_v62  ;;  %v71_v7 = vmul.f32 %v55_v58, %v55_v58  ;;  %v94_v8 = vsel %vm76_vm0, %v69_v59, 0.0  ;;  %s124_s17 = scalar_lea.vmem %s116_s1, 128  ;;  %p129_p1 = scmp.lt.s32.totalorder %s116_s1, %s116_s1 }
   0xf   :  { %v85_v51 = vadd.f32 %v84_v42, %v83_v45  ;;  %v58_v12 = vsub.f32 %v26_v3, %v42_v4  ;;  %v72_v13 = vmul.f32 %v56_v0, %v56_v0  ;;  %v96_v14 = vsel %vm76_vm0, %v70_v1, 0.0  ;;  %p125_p0 = scmp.ne.s32.totalorder %s116_s1, %s124_s17  ;;  %p130_p2 = scmp.lt.s32.totalorder %s124_s17, %s124_s17 }
  0x10   :  { %v59_v16 = vsub.f32 %v27_v9, %v43_v10  ;;  %v73_v17 = vmul.f32 %v57_v6, %v57_v6  ;;  %v98_v18 = vsel %vm76_vm0, %v71_v7, 0.0 }
  0x11   :  { %v87_v57 = vadd.f32 %v86_v48, %v85_v51  ;;  %v74_v20 = vmul.f32 %v58_v12, %v58_v12  ;;  %v100_v21 = vsel %vm76_vm0, %v72_v13, 0.0  ;;  %p131_p3 = por %p130_p2, %p129_p1 }
  0x12   :  { %v75_v23 = vmul.f32 %v59_v16, %v59_v16  ;;  %v102_v24 = vsel %vm76_vm0, %v73_v17, 0.0 }
  0x13   :  { %v89_v63 = vadd.f32 %v88_v54, %v87_v57  ;;  %v104_v26 = vsel %vm76_vm0, %v74_v20, 0.0  ;;  %p132_p4 = pnand %p131_p3, %p125_p0 }
  0x14   :  { %v106_v28 = vsel %vm76_vm0, %v75_v23, 0.0 }
  0x15   :  { %v91_v5 = vadd.f32 %v90_v60, %v89_v63 }
  0x17   :  { %v93_v11 = vadd.f32 %v92_v2, %v91_v5 }
  0x19   :  { %v95_v15 = vadd.f32 %v94_v8, %v93_v11 }
  0x1b   :  { %v97_v19 = vadd.f32 %v96_v14, %v95_v15 }
  0x1d   :  { %v99_v22 = vadd.f32 %v98_v18, %v97_v19 }
  0x1f   :  { %v101_v25 = vadd.f32 %v100_v21, %v99_v22 }
  0x21   :  { %v103_v27 = vadd.f32 %v102_v24, %v101_v25 }
  0x23   :  { %v105_v29 = vadd.f32 %v104_v26, %v103_v27 }
  0x25   :  { %v107_v30 = vadd.f32 %v106_v28, %v105_v29 }
  0x27   :  { %108 = vst.msk [vmem:[#allocation2] sm:$0xff] %vm76_vm0, %v107_v30 }
  0x28   :  { %135 = shalt.err (!%p132_p4)
}
  0x29   :  { %118 = dma.vmem_to_hbm [thread:$0]  %s116_s1, 128, %s280_s2, [#allocation3]  }
  0x2a   :  { %144 = dma.done.wait [#allocation3], 128  }
  0x2b   :  { %145 = vsyncadd [#allocation3], 4294967168 }
  0x2c   :  { %122 = vsyncpa [#allocation3], 1 }

</bundles_post_ra>
